<compile_context>
chip_gen: v7x
topology: tpu7x:2x2x1
jax: 0.10.0
libtpu: 0.0.40
codegen_flags: <defaults>
</compile_context>

<pallas_src>
import functools
import math
import numpy as np
import jax
import jax.numpy as jnp
from jax import lax
from jax.experimental import pallas as pl
from jax.experimental.pallas import tpu as pltpu

_SQRT_HALF = 0.7071067811865476


# --------------------------------------------------------------------------
# In-kernel math helpers
# --------------------------------------------------------------------------
def _erf(x):
    # Abramowitz-Stegun 7.1.26 polynomial, |abs err| < 1.5e-7 vs exact erf.
    a1, a2, a3, a4, a5 = (0.254829592, -0.284496736, 1.421413741,
                          -1.453152027, 1.061405429)
    p = 0.3275911
    s = jnp.where(x >= 0.0, 1.0, -1.0)
    ax = jnp.abs(x)
    t = 1.0 / (1.0 + p * ax)
    poly = ((((a5 * t + a4) * t + a3) * t + a2) * t + a1) * t
    return s * (1.0 - poly * jnp.exp(-ax * ax))


def _gelu(x):
    return 0.5 * x * (1.0 + _erf(x * _SQRT_HALF))


# --------------------------------------------------------------------------
# Kernel 1: DataEmbedding  (circular Conv1d(k=3, no bias) + positional emb)
# --------------------------------------------------------------------------
def _embed_kernel(xp_ref, w_ref, pos_ref, o_ref, *, T, K):
    acc = jnp.dot(xp_ref[0, 0:T, :], w_ref[0],
                  preferred_element_type=jnp.float32)
    for d in range(1, K):
        acc = acc + jnp.dot(xp_ref[0, d:d + T, :], w_ref[d],
                            preferred_element_type=jnp.float32)
    o_ref[0] = acc + pos_ref[...]


@jax.jit
def data_embedding(x, w_taps, pos_emb):
    B, T, Cin = x.shape
    K, _, D = w_taps.shape
    pad = (K - 1) // 2
    xp = jnp.concatenate([x[:, T - pad:, :], x, x[:, :pad, :]], axis=1)  # circular
    return pl.pallas_call(
        functools.partial(_embed_kernel, T=T, K=K),
        grid=(B,),
        in_specs=[pl.BlockSpec((1, T + 2 * pad, Cin), lambda b: (b, 0, 0)),
                  pl.BlockSpec((K, Cin, D), lambda b: (0, 0, 0)),
                  pl.BlockSpec((T, D), lambda b: (0, 0))],
        out_specs=pl.BlockSpec((1, T, D), lambda b: (b, 0, 0)),
        out_shape=jax.ShapeDtypeStruct((B, T, D), jnp.float32),
        compiler_params=pltpu.CompilerParams(dimension_semantics=("parallel",)),
    )(xp, w_taps, pos_emb)


# --------------------------------------------------------------------------
# Kernel 2: batched DFT amplitude  (|rfft| channel-mean per batch + freq list)
# --------------------------------------------------------------------------
def _fft_amp_kernel(xt_ref, cos_ref, sin_ref, avg_ref, amp_ref, freq_ref):
    xt = xt_ref[...]                                                     # (T, B*N)
    re = jnp.dot(cos_ref[...], xt, preferred_element_type=jnp.float32)   # (F, B*N)
    im = jnp.dot(sin_ref[...], xt, preferred_element_type=jnp.float32)
    amp = jnp.sqrt(re * re + im * im)
    amp_fb = jnp.dot(amp, avg_ref[...],
                     preferred_element_type=jnp.float32)                 # (F, B)
    amp_ref[...] = amp_fb
    fl = jnp.mean(amp_fb, axis=1, keepdims=True)                         # (F, 1)
    row = lax.broadcasted_iota(jnp.int32, fl.shape, 0)
    freq_ref[...] = jnp.where(row == 0, 0.0, fl)                         # zero DC


@functools.partial(jax.jit, static_argnames=("k",))
def fft_period_weights(x, cos_m, sin_m, *, k):
    B, T, N = x.shape
    Fr = cos_m.shape[0]
    xt = jnp.transpose(x, (1, 0, 2)).reshape(T, B * N)
    avg = jnp.kron(jnp.eye(B, dtype=jnp.float32),
                   jnp.full((N, 1), 1.0 / N, jnp.float32))               # (B*N, B)
    amp_fb, freq = pl.pallas_call(
        _fft_amp_kernel,
        grid=(1,),
        in_specs=[pl.BlockSpec((T, B * N), lambda i: (0, 0)),
                  pl.BlockSpec((Fr, T), lambda i: (0, 0)),
                  pl.BlockSpec((Fr, T), lambda i: (0, 0)),
                  pl.BlockSpec((B * N, B), lambda i: (0, 0))],
        out_specs=[pl.BlockSpec((Fr, B), lambda i: (0, 0)),
                   pl.BlockSpec((Fr, 1), lambda i: (0, 0))],
        out_shape=(jax.ShapeDtypeStruct((Fr, B), jnp.float32),
                   jax.ShapeDtypeStruct((Fr, 1), jnp.float32)),
    )(xt, cos_m, sin_m, avg)
    _, top_idx = lax.top_k(freq[:, 0], k)                 # on-device top-k
    period_weight = jnp.take(amp_fb, top_idx, axis=0).T   # (B, k)
    return period_weight, top_idx


# --------------------------------------------------------------------------
# Kernel 3: fused TimesBlock conv  (merged Inception1 -> GELU -> Inception2)
#
# The period-2D grid is processed in a "flattened padded" layout (Hp*Wp rows,
# channels on lanes).  Every conv tap is then a contiguous sublane slice +
# MXU dot accumulated in f32; the GELU'd intermediate is scattered (with the
# garbage columns masked) into a zero-padded VMEM scratch that directly feeds
# the second conv.  No reshapes inside the kernel, no HBM im2col.
# --------------------------------------------------------------------------
def _times_conv_kernel(x_ref, w1_ref, b1_ref, w2_ref, b2_ref, o_ref, y_ref,
                       *, H, W, Wp, pad, KK):
    HWp = H * Wp
    maxk = 2 * pad + 1
    # ----- Inception 1 (d_model -> d_ff) + bias + GELU epilogue -----------
    acc = jnp.dot(x_ref[0, 0:HWp, :], w1_ref[0],
                  preferred_element_type=jnp.float32)
    for t in range(1, KK):
        dy, dx = divmod(t, maxk)
        off = dy * Wp + dx
        acc = acc + jnp.dot(x_ref[0, off:off + HWp, :], w1_ref[t],
                            preferred_element_type=jnp.float32)
    h = _gelu(acc + b1_ref[...])
    # zero the (Wp - W) wrap-around columns, scatter into padded scratch
    col = lax.broadcasted_iota(jnp.int32, (HWp, 1), 0) % Wp
    h = jnp.where(col < W, h, 0.0)
    y_ref[...] = jnp.zeros_like(y_ref)
    start = pad * Wp + pad
    y_ref[start:start + HWp, :] = h
    # ----- Inception 2 (d_ff -> d_model) + bias ----------------------------
    acc2 = jnp.dot(y_ref[0:HWp, :], w2_ref[0],
                   preferred_element_type=jnp.float32)
    for t in range(1, KK):
        dy, dx = divmod(t, maxk)
        off = dy * Wp + dx
        acc2 = acc2 + jnp.dot(y_ref[off:off + HWp, :], w2_ref[t],
                              preferred_element_type=jnp.float32)
    o_ref[0] = acc2 + b2_ref[...]


@functools.lru_cache(maxsize=None)
def _make_times_conv(period):
    """Jitted per-period conv branch (cached so each static period compiles once)."""

    @jax.jit
    def run(x, w1, b1, w2, b2):
        B, T, N = x.shape
        KK, _, Dff = w1.shape
        maxk = math.isqrt(KK)
        pad = maxk // 2
        p = period
        if T % p == 0:
            L, xe = T, x
        else:
            L = (T // p + 1) * p
            xe = jnp.concatenate([x, jnp.zeros((B, L - T, N), x.dtype)], axis=1)
        H, W = L // p, p
        Hp, Wp = H + 2 * pad, W + 2 * pad
        slack = 2 * pad                       # slack rows so all tap slices are in-bounds
        g = xe.reshape(B, H, W, N)
        g = jnp.pad(g, ((0, 0), (pad, pad), (pad, pad), (0, 0)))
        xf = g.reshape(B, Hp * Wp, N)
        xf = jnp.pad(xf, ((0, 0), (0, slack), (0, 0)))
        out = pl.pallas_call(
            functools.partial(_times_conv_kernel,
                              H=H, W=W, Wp=Wp, pad=pad, KK=KK),
            grid=(B,),
            in_specs=[pl.BlockSpec((1, Hp * Wp + slack, N), lambda b: (b, 0, 0)),
                      pl.BlockSpec((KK, N, Dff), lambda b: (0, 0, 0)),
                      pl.BlockSpec((1, Dff), lambda b: (0, 0)),
                      pl.BlockSpec((KK, Dff, N), lambda b: (0, 0, 0)),
                      pl.BlockSpec((1, N), lambda b: (0, 0))],
            out_specs=pl.BlockSpec((1, H * Wp, N), lambda b: (b, 0, 0)),
            out_shape=jax.ShapeDtypeStruct((B, H * Wp, N), jnp.float32),
            scratch_shapes=[pltpu.VMEM((Hp * Wp + slack, Dff), jnp.float32)],
            compiler_params=pltpu.CompilerParams(
                dimension_semantics=("parallel",)),
        )(xf, w1, b1, w2, b2)
        # drop the Wp - W garbage columns, truncate padding back to T
        out = out.reshape(B, H, Wp, N)[:, :, :W, :].reshape(B, L, N)
        return out[:, :T, :]

    return run


# --------------------------------------------------------------------------
# Kernel 4: fused softmax period-aggregation + residual + LayerNorm
# --------------------------------------------------------------------------
def _agg_ln_kernel(res_ref, pw_ref, x_ref, g_ref, b_ref, o_ref, *, k, eps):
    pw = pw_ref[0]                                        # (1, k)
    pw = pw - jnp.max(pw, axis=-1, keepdims=True)
    e = jnp.exp(pw)
    w = e / jnp.sum(e, axis=-1, keepdims=True)
    acc = x_ref[0]                                        # residual, (T, N)
    for i in range(k):
        acc = acc + res_ref[i, 0] * w[0:1, i:i + 1]
    mu = jnp.mean(acc, axis=-1, keepdims=True)
    var = jnp.mean((acc - mu) ** 2, axis=-1, keepdims=True)
    o_ref[0] = (acc - mu) * lax.rsqrt(var + eps) * g_ref[...] + b_ref[...]


@jax.jit
def aggregate_and_layernorm(period_weight, x, gamma, beta, *res):
    k = len(res)
    B, T, N = x.shape
    res_stack = jnp.stack(res, axis=0)                    # (k, B, T, N)
    pw3 = period_weight.reshape(B, 1, k)
    return pl.pallas_call(
        functools.partial(_agg_ln_kernel, k=k, eps=1e-5),
        grid=(B,),
        in_specs=[pl.BlockSpec((k, 1, T, N), lambda b: (0, b, 0, 0)),
                  pl.BlockSpec((1, 1, k), lambda b: (b, 0, 0)),
                  pl.BlockSpec((1, T, N), lambda b: (b, 0, 0)),
                  pl.BlockSpec((1, N), lambda b: (0, 0)),
                  pl.BlockSpec((1, N), lambda b: (0, 0))],
        out_specs=pl.BlockSpec((1, T, N), lambda b: (b, 0, 0)),
        out_shape=jax.ShapeDtypeStruct((B, T, N), jnp.float32),
        compiler_params=pltpu.CompilerParams(dimension_semantics=("parallel",)),
    )(res_stack, pw3, x, gamma.reshape(1, N), beta.reshape(1, N))


# --------------------------------------------------------------------------
# Kernel 5: classifier head  (gelu -> mask -> max-pool over time -> linear)
# --------------------------------------------------------------------------
def _head_kernel(x_ref, m_ref, w_ref, b_ref, o_ref):
    y = _gelu(x_ref[...])                 # output = act(x); dropout = identity
    y = y * m_ref[...]                    # output * mask.unsqueeze(1)  (pre-pool, as in ref)
    pooled = jnp.max(y, axis=1)           # AdaptiveMaxPool1d(1) over time
    o_ref[...] = jnp.dot(pooled, w_ref[...],
                         preferred_element_type=jnp.float32) + b_ref[...]


@jax.jit
def classifier_head(x, mask, w_t, bias):
    B, T, D = x.shape
    C = w_t.shape[1]
    return pl.pallas_call(
        _head_kernel,
        grid=(1,),
        in_specs=[pl.BlockSpec((B, T, D), lambda i: (0, 0, 0)),
                  pl.BlockSpec((B, T, 1), lambda i: (0, 0, 0)),
                  pl.BlockSpec((D, C), lambda i: (0, 0)),
                  pl.BlockSpec((1, C), lambda i: (0, 0))],
        out_specs=pl.BlockSpec((B, C), lambda i: (0, 0)),
        out_shape=jax.ShapeDtypeStruct((B, C), jnp.float32),
    )(x, mask.reshape(B, T, 1), w_t, bias.reshape(1, C))


# --------------------------------------------------------------------------
# Forward pass
# --------------------------------------------------------------------------
def times_block(x, blk, top_k, dft_cos, dft_sin):
    B, T, N = x.shape
    period_weight, top_idx = fft_period_weights(x, dft_cos, dft_sin, k=top_k)
    # Single tiny host transfer per block (k int32 indices): the reference's
    # data-dependent reshape needs static periods, like torch's .cpu().numpy().
    top_host = np.asarray(jax.device_get(top_idx))
    res = []
    for i in range(top_k):
        f = int(top_host[i])
        p = T // f if f != 0 else 0
        if p == 0:
            p = 1
        res.append(_make_times_conv(p)(x, blk["w1"], blk["b1"],
                                       blk["w2"], blk["b2"]))
    return res, period_weight


def model_forward(x_enc, x_mask, params, cfg):
    # pos = -1 -> timepooling = Nothing(); dropout layers are eval-mode identity.
    if x_enc.ndim == 2:
        x_enc = x_enc[..., None]
    B, T, _ = x_enc.shape
    x = data_embedding(x_enc, params["token_w_taps"], params["pos_emb"])
    for blk in params["blocks"]:
        res, period_weight = times_block(x, blk, cfg["top_k"],
                                         params["dft_cos"], params["dft_sin"])
        x = aggregate_and_layernorm(period_weight, x,
                                    params["ln_g"], params["ln_b"], *res)
    mask = x_mask if x_mask is not None else jnp.ones((B, T), jnp.float32)
    return classifier_head(x, mask, params["proj_w_t"], params["proj_b"])


# --------------------------------------------------------------------------
# Deterministic parameter construction (all layout prep hoisted here)
# --------------------------------------------------------------------------
def positional_embedding(T, D):
    position = np.arange(T, dtype=np.float32)[:, None]
    div_term = np.exp(np.arange(0, D, 2, dtype=np.float32) * -(np.log(10000.0) / D))
    pe = np.zeros((T, D), dtype=np.float32)
    pe[:, 0::2] = np.sin(position * div_term)
    pe[:, 1::2] = np.cos(position * div_term)
    return jnp.asarray(pe)


def _merge_inception(weights, biases):
    """Mean of ks same-pad Conv2d branches == one conv with the max kernel whose
    weight is the centred zero-padded sum / ks.  Returns ((maxk*maxk, Cin, Cout),
    (1, Cout)) ready for the tap-indexed in-kernel accumulation."""
    ks = len(weights)
    maxk = weights[-1].shape[-1]
    Cout, Cin = weights[0].shape[0], weights[0].shape[1]
    merged = jnp.zeros((maxk, maxk, Cin, Cout), jnp.float32)
    for wgt in weights:
        ksz = wgt.shape[-1]
        off = (maxk - ksz) // 2
        w4 = jnp.transpose(wgt, (2, 3, 1, 0))           # (ksz, ksz, Cin, Cout)
        merged = merged.at[off:off + ksz, off:off + ksz].add(w4)
    merged = merged / float(ks)
    bias = (sum(biases) / float(ks)).reshape(1, Cout)
    return merged.reshape(maxk * maxk, Cin, Cout), bias


def init_params(key, cfg):
    c_in, D, Dff = cfg["c_in"], cfg["d_model"], cfg["d_ff"]
    ks, L, C, T = cfg["ks"], cfg["e_layers"], cfg["class_num"], cfg["seq_len"]
    keys = iter(jax.random.split(key, 8 + L * ks * 4))

    def nrm(shape, fan_in):
        return (jax.random.normal(next(keys), shape, jnp.float32)
                / np.sqrt(float(fan_in))).astype(jnp.float32)

    token_w = nrm((D, c_in, 3), c_in * 3)               # PyTorch Conv1d layout
    params = {
        "token_w_taps": jnp.transpose(token_w, (2, 1, 0)),   # (tap, Cin, D)
        "pos_emb": positional_embedding(T, D),
        "ln_g": jnp.ones((D,), jnp.float32),
        "ln_b": jnp.zeros((D,), jnp.float32),
        "proj_w_t": nrm((D, C), D),                     # W.T of nn.Linear
        "proj_b": nrm((C,), D),
    }
    blocks = []
    for _ in range(L):
        w1, b1, w2, b2 = [], [], [], []
        for i in range(ks):
            ksz = 2 * i + 1
            w1.append(nrm((Dff, D, ksz, ksz), D * ksz * ksz))
            b1.append(nrm((Dff,), D * ksz * ksz))
            w2.append(nrm((D, Dff, ksz, ksz), Dff * ksz * ksz))
            b2.append(nrm((D,), Dff * ksz * ksz))
        mw1, mb1 = _merge_inception(w1, b1)
        mw2, mb2 = _merge_inception(w2, b2)
        blocks.append({"w1": mw1, "b1": mb1, "w2": mw2, "b2": mb2})
    params["blocks"] = blocks

    Fr = T // 2 + 1
    ang = 2.0 * np.pi * np.outer(np.arange(Fr), np.arange(T)) / T
    params["dft_cos"] = jnp.asarray(np.cos(ang), dtype=jnp.float32)
    params["dft_sin"] = jnp.asarray(np.sin(ang), dtype=jnp.float32)
    return params


# --------------------------------------------------------------------------
if __name__ == "__main__":
    cfg = dict(seq_len=16, c_in=3, d_model=16, d_ff=16, ks=3, top_k=2,
               e_layers=2, class_num=4)
    B, T = 2, cfg["seq_len"]

    key = jax.random.PRNGKey(0)
    kx, kp = jax.random.split(key, 2)
    x_enc = jax.random.normal(kx, (B, T, cfg["c_in"]), jnp.float32)
    x_mask = jnp.ones((B, T), jnp.float32)
    length = jnp.full((B,), T, jnp.int32)    # unused: pos = -1 (no time pooling)

    params = init_params(kp, cfg)
    out = model_forward(x_enc, x_mask, params, cfg)
    out = jax.block_until_ready(out)

    assert out.shape == (B, cfg["class_num"])
    assert bool(jnp.all(jnp.isfinite(out)))
    print("KERNEL_OK")
</pallas_src>

<mosaic_0001>
module attributes {stable_mosaic.version = 11 : i64} {
  func.func @_embed_kernel(%arg0: i32, %arg1: memref<1x18x3xf32, #tpu.memory_space<vmem>>, %arg2: memref<3x3x16xf32, #tpu.memory_space<vmem>>, %arg3: memref<16x16xf32, #tpu.memory_space<vmem>>, %arg4: memref<1x16x16xf32, #tpu.memory_space<vmem>>) attributes {dimension_semantics = [#tpu.dimension_semantics<parallel>], iteration_bounds = array<i64: 2>, scalar_prefetch = 0 : i64, scratch_operands = 0 : i64, tpu.core_type = #tpu.core_type<tc>, window_params = [{transform_indices = @transform_0, window_bounds = array<i64: 1, 18, 3>}, {pipeline_mode = #tpu.pipeline_mode<synchronous>, transform_indices = @transform_1, window_bounds = array<i64: 3, 3, 16>}, {pipeline_mode = #tpu.pipeline_mode<synchronous>, transform_indices = @transform_2, window_bounds = array<i64: 16, 16>}, {transform_indices = @transform_3, window_bounds = array<i64: 1, 16, 16>}]} {
    %c0 = arith.constant 0 : index
    %c0_0 = arith.constant 0 : index
    %c0_1 = arith.constant 0 : index
    %0 = vector.load %arg1[%c0, %c0_0, %c0_1] : memref<1x18x3xf32, #tpu.memory_space<vmem>>, vector<1x16x3xf32>
    %1 = vector.shape_cast %0 : vector<1x16x3xf32> to vector<16x3xf32>
    %c0_2 = arith.constant 0 : index
    %c0_3 = arith.constant 0 : index
    %c0_4 = arith.constant 0 : index
    %2 = vector.load %arg2[%c0_2, %c0_3, %c0_4] : memref<3x3x16xf32, #tpu.memory_space<vmem>>, vector<1x3x16xf32>
    %3 = vector.shape_cast %2 : vector<1x3x16xf32> to vector<3x16xf32>
    %cst = arith.constant dense<0.000000e+00> : vector<16x16xf32>
    %4 = tpu.matmul %1, %3, %cst {dimension_numbers = #tpu.dot_dimension_numbers<[1], [0], [0], [1], [0, 0, 1, 1], [], []>} : vector<16x3xf32>, vector<3x16xf32>, vector<16x16xf32> -> vector<16x16xf32>
    %c0_5 = arith.constant 0 : index
    %c1 = arith.constant 1 : index
    %c0_6 = arith.constant 0 : index
    %5 = vector.load %arg1[%c0_5, %c1, %c0_6] : memref<1x18x3xf32, #tpu.memory_space<vmem>>, vector<1x16x3xf32>
    %6 = vector.shape_cast %5 : vector<1x16x3xf32> to vector<16x3xf32>
    %c1_7 = arith.constant 1 : index
    %c0_8 = arith.constant 0 : index
    %c0_9 = arith.constant 0 : index
    %7 = vector.load %arg2[%c1_7, %c0_8, %c0_9] : memref<3x3x16xf32, #tpu.memory_space<vmem>>, vector<1x3x16xf32>
    %8 = vector.shape_cast %7 : vector<1x3x16xf32> to vector<3x16xf32>
    %cst_10 = arith.constant dense<0.000000e+00> : vector<16x16xf32>
    %9 = tpu.matmul %6, %8, %cst_10 {dimension_numbers = #tpu.dot_dimension_numbers<[1], [0], [0], [1], [0, 0, 1, 1], [], []>} : vector<16x3xf32>, vector<3x16xf32>, vector<16x16xf32> -> vector<16x16xf32>
    %10 = arith.addf %4, %9 : vector<16x16xf32>
    %c0_11 = arith.constant 0 : index
    %c2 = arith.constant 2 : index
    %c0_12 = arith.constant 0 : index
    %11 = vector.load %arg1[%c0_11, %c2, %c0_12] : memref<1x18x3xf32, #tpu.memory_space<vmem>>, vector<1x16x3xf32>
    %12 = vector.shape_cast %11 : vector<1x16x3xf32> to vector<16x3xf32>
    %c2_13 = arith.constant 2 : index
    %c0_14 = arith.constant 0 : index
    %c0_15 = arith.constant 0 : index
    %13 = vector.load %arg2[%c2_13, %c0_14, %c0_15] : memref<3x3x16xf32, #tpu.memory_space<vmem>>, vector<1x3x16xf32>
    %14 = vector.shape_cast %13 : vector<1x3x16xf32> to vector<3x16xf32>
    %cst_16 = arith.constant dense<0.000000e+00> : vector<16x16xf32>
    %15 = tpu.matmul %12, %14, %cst_16 {dimension_numbers = #tpu.dot_dimension_numbers<[1], [0], [0], [1], [0, 0, 1, 1], [], []>} : vector<16x3xf32>, vector<3x16xf32>, vector<16x16xf32> -> vector<16x16xf32>
    %16 = arith.addf %10, %15 : vector<16x16xf32>
    %c0_17 = arith.constant 0 : index
    %c0_18 = arith.constant 0 : index
    %17 = vector.load %arg3[%c0_17, %c0_18] : memref<16x16xf32, #tpu.memory_space<vmem>>, vector<16x16xf32>
    %18 = arith.addf %16, %17 : vector<16x16xf32>
    %c0_19 = arith.constant 0 : index
    %c0_20 = arith.constant 0 : index
    %c0_21 = arith.constant 0 : index
    %19 = vector.load %arg4[%c0_19, %c0_20, %c0_21] : memref<1x16x16xf32, #tpu.memory_space<vmem>>, vector<1x16x16xf32>
    %20 = vector.shape_cast %19 : vector<1x16x16xf32> to vector<16x16xf32>
    %21 = vector.shape_cast %18 : vector<16x16xf32> to vector<1x16x16xf32>
    tpu.vector_store %arg4[%c0_19, %c0_20, %c0_21], %21 {strides = array<i32>} : memref<1x16x16xf32, #tpu.memory_space<vmem>>, vector<1x16x16xf32>,
    return
  }
  func.func @transform_0(%arg0: i32) -> (i32, i32, i32) {
    %c0_i32 = arith.constant 0 : i32
    %c0_i32_0 = arith.constant 0 : i32
    %c0_i32_1 = arith.constant 0 : i32
    return %arg0, %c0_i32, %c0_i32_0 : i32, i32, i32
  }
  func.func @transform_1(%arg0: i32) -> (i32, i32, i32) {
    %c0_i32 = arith.constant 0 : i32
    %c0_i32_0 = arith.constant 0 : i32
    %c0_i32_1 = arith.constant 0 : i32
    %c0_i32_2 = arith.constant 0 : i32
    return %c0_i32, %c0_i32_0, %c0_i32_1 : i32, i32, i32
  }
  func.func @transform_2(%arg0: i32) -> (i32, i32) {
    %c0_i32 = arith.constant 0 : i32
    %c0_i32_0 = arith.constant 0 : i32
    %c0_i32_1 = arith.constant 0 : i32
    return %c0_i32, %c0_i32_0 : i32, i32
  }
  func.func @transform_3(%arg0: i32) -> (i32, i32, i32) {
    %c0_i32 = arith.constant 0 : i32
    %c0_i32_0 = arith.constant 0 : i32
    %c0_i32_1 = arith.constant 0 : i32
    return %arg0, %c0_i32, %c0_i32_0 : i32, i32, i32
  }
}

</mosaic_0001>

<bundles_post_ra>
// kernel: data_embedding.1
= control target key start
LH: loop header
LB: loop body
LE: loop exit
PB: predicated region body
PF: predicated region fallthrough
CT: control target
= control target key end

     0   :  { %8 = vsyncpa [#allocation3], 0  ;;  %s823_s0 = inlined_call_operand.vmem [shape: f32[2,18,3], index: 0, kind: input, shape index: {}]   ;;  %s824_s1 = inlined_call_operand.vmem [shape: f32[3,3,16], index: 1, kind: input, shape index: {}]   ;;  %s825_s2 = inlined_call_operand.vmem [shape: f32[16,16], index: 2, kind: input, shape index: {}]   ;;  %s826_s3 = inlined_call_operand.hbm [shape: f32[2,16,16], index: 3, kind: output, shape index: {}]  }
   0x1   :  { %10 = vsyncpa [#allocation3 + $0x1], 0  ;;  %s699_s12 = smov 0   ;;  %s701_s13 = smov 0  }
   0x2   :  { %s703_s14 = smov 0   ;;  %s705_s15 = smov 0  }
   0x3 LB: > { %s720_s16 = sadd.s32 4294967295, %s674_s15   ;;  %s519_s17 = sadd.s32 4294967294, %s674_s15   ;;  %s674_s15 = sphi %s705_s15, %s832_s15   ;;  %s670_s14 = sphi %s703_s14, %s831_s14   ;;  %s666_s13 = sphi %s701_s13, %s830_s13   ;;  %s662_s12 = sphi %s699_s12, %s829_s12  }
   0x4   : > { %s724_s18 = sadd.s32 1, %s674_s15   ;;  %s91_s19 = sadd.s32 1, %s670_s14 }
   0x5   : > { %s88_s20 = ssub.s32 %s674_s15, %s724_s18  ;;  %p101_p0 = scmp.ne.s32.totalorder %s670_s14, %s666_s13 }
   0x6   : > { %p89_p1 = scmp.eq.s32.totalorder %s88_s20, 0  ;;  %p102_p2 = scmp.eq.s32.totalorder %s720_s16, 1 }
   0x7   : > { %p107_p3 = scmp.ne.s32.totalorder %s666_s13, %s662_s12  ;;  %p108_p4 = scmp.eq.s32.totalorder %s519_s17, 1 }
   0x8   : > { %s735_s21 = scalar_select %p89_p1, %s670_s14, %s91_s19  }
   0x9   : > { %p737_p5 = por %p102_p2, %p101_p0  ;;  %p741_p6 = por %p108_p4, %p107_p3 }
   0xa   : > { %p522_p7 = scmp.ge.s32.totalorder %s674_s15, 1  ;;  %p140_p8 = scmp.lt.s32.totalorder %s674_s15, 3 }
   0xc   : > { %p141_p9 = pnand %p522_p7, %p140_p8 }
   0xd   : > { %v171_v0 = vld [vmem:[%s824_s1] sm:$0x7] (!%p141_p9)  ;;  %vm183_vm0 = vcmask (!%p141_p9), 1042432   ;;  %p164_p10 = scmp.lt.s32.totalorder (!%p141_p9), %s720_s16, 1  ;;  %v532_v1 = vld [vmem:[%s824_s1 + $0x8] sm:$0x7] (!%p141_p9) }
   0xe   : > { %144 = sbr.rel (%p141_p9) target bundleno = 268 (0x10c), region = 32  ;;  %556 = vmatprep.subr.msk.mxu0 (!%p141_p9), %vm183_vm0, %v171_v0  ;;  %v525_v2 = vld [vmem:[%s824_s1 + $0x4] sm:$0x7] (!%p141_p9)  ;;  %vm176_vm1 = vcmask (!%p141_p9), 23552   ;;  %s161_s8 = sand.u32 (!%p141_p9), 1, %s666_s13   ;;  %v437_v12 = vld [vmem:[%s825_s2 + $0x8] sm:$0xff] (!%p141_p9) }
   0xf   : > { %557 = vmatpush3.msk.msra.mxu0 (!%p141_p9), %vm183_vm0, %v171_v0  ;;  %551 = vmatprep.subr.msk.mxu1 (!%p141_p9), %vm183_vm0, %v525_v2  ;;  %s523_s9 = sshll.u32 (!%p141_p9), %s161_s8, 4  ;;  %s541_s20 = sshll.u32 (!%p141_p9), %s720_s16, 8  ;;  %v436_v15 = vld [vmem:[%s825_s2] sm:$0xff] (!%p141_p9)  ;;  %vm440_vm2 = vcmask (!%p141_p9), 130048  }
  0x10   : > { %561 = vmatprep.subr.msk.mxu0 (!%p141_p9), %vm183_vm0, %v532_v1  ;;  %552 = vmatpush3.msk.msra.mxu1 (!%p141_p9), %vm183_vm0, %v525_v2  ;;  %s163_s17 = scalar_lea.vmem (!%p141_p9), [#allocation2], %s523_s9  ;;  %s778_s28 = scalar_lea.hbm (!%p141_p9), %s826_s3, %s541_s20 }
  0x11   : > { %s457_s19 = sshll.u32 (!%p141_p9), %s163_s17, 4  ;;  %s780_s19 = int_to_ptr.vmem [resolvable:$true] %s457_s19 }
  0x12   : > { %s612_s29 = scalar_lea.vmem (!%p141_p9), %s780_s19, 256 }
  0x13   : > { %p613_p11 = scmp.ne.s32.totalorder (!%p141_p9), %s780_s19, %s612_s29 }
  0x15   : > { %s165_s30 = scalar_select %p164_p10, %s720_s16, 1 }
  0x16   : > { %s782_s16 = scalar_lea.sflag [#allocation3], %s161_s8  ;;  %p614_p12 = pnand %p613_p11, %p737_p5 }
  0x17   : > { %s570_s4 = smul.u32 24, %s165_s30  ;;  %s676_s30 = smov [#allocation2]  }
  0x18   : > { %p615_p13 = pneg %p614_p12 }
  0x19   : > { %s168_s7 = scalar_lea.vmem %s823_s0, %s570_s4  ;;  %s616_s4 = sshll.u32 %s676_s30, 4  ;;  %s617_s4 = int_to_ptr.vmem [resolvable:$false] %s616_s4 }
  0x1a   : > { %v169_v3 = vld [vmem:[%s168_s7] sm:$0xff]  ;;  %v170_v4 = vld [vmem:[%s168_s7 + $0x8] sm:$0xff]  ;;  %s618_s5 = scalar_lea.vmem %s617_s4, 512  ;;  %p619_p0 = scmp.lt.s32.totalorder %s780_s19, %s617_s4 }
  0x1b   : > { %v172_v5 = vld [vmem:[%s168_s7 + $0x1] sm:$0xff]  ;;  %558 = vmatprep.mubr.msk.f32.mxu0 %vm176_vm1, %v169_v3  ;;  %v173_v6 = vld [vmem:[%s168_s7 + $0x9] sm:$0xff]  ;;  %p620_p1 = scmp.lt.s32.totalorder %s618_s5, %s612_s29 }
  0x1c   : > { %553 = vmatprep.mubr.msk.f32.mxu1 %vm176_vm1, %v172_v5  ;;  %v346_v7 = vld [vmem:[%s168_s7 + $0x2] sm:$0xff]  ;;  %559 = vmatmul.mubr.msk.f32.vlgmr.msra.gmra.mrb[0].mxu0 %vm176_vm1, %v170_v4  ;;  %v347_v8 = vld [vmem:[%s168_s7 + $0xa] sm:$0xff] }
  0x1d   : > { %554 = vmatmul.mubr.msk.f32.vlgmr.msra.gmra.mrb[0].mxu1 %vm176_vm1, %v173_v6  ;;  %562 = vmatpush3.msk.msra.mxu0 %vm183_vm0, %v532_v1  ;;  %p621_p2 = por %p620_p1, %p619_p0 }
  0x1e   : > { %563 = vmatprep.mubr.msk.f32.mxu0 %vm176_vm1, %v346_v7 }
  0x1f   : > { %p622_p3 = pnand %p621_p2, %p615_p13 }
  0x24   : > { %564 = vmatmul.mubr.msk.f32.vlgmr.msra.gmra.mrb[0].mxu0 %vm176_vm1, %v347_v8 }
  0xf0   : > { %v555_v9 = vpop.f32.mrb[0].mxu1 }
  0xf1   : > { %v253_v10 = vpop.f32.mrb[1].mxu1 }
  0xf7   : > { %v565_v11 = vpop.f32.mrb[0].mxu0 }
  0xf8   : > { %v566_v13 = vadd.f32 %v565_v11, %v555_v9  ;;  %v425_v14 = vpop.f32.mrb[1].mxu0 }
  0xf9   : > { %v567_v16 = vadd.f32 %v425_v14, %v253_v10 }
  0xfa   : > { %v439_v17 = vadd.f32 %v566_v13, %v437_v12 }
  0xfb   : > { %v438_v18 = vadd.f32 %v567_v16, %v436_v15 }
  0xfc   : > { %442 = vst.msk [vmem:[%s163_s17 + $0x8] sm:$0xff] %vm440_vm2, %v439_v17 }
  0xfd   : > { %441 = vst.msk [vmem:[%s163_s17] sm:$0xff] %vm440_vm2, %v438_v18 }
  0xfe   : > { %625 = shalt.err (!%p622_p3)
}
  0xff   : > { %s626_s6 = scalar_lea.hbm %s778_s28, 256  ;;  %s630_s9 = scalar_lea.hbm %s826_s3, 512 }
 0x100   : > { %p627_p4 = scmp.ne.s32.totalorder %s778_s28, %s626_s6  ;;  %p631_p9 = scmp.lt.u32.totalorder %s778_s28, %s826_s3 }
 0x101   : > { %p632_p10 = scmp.lt.u32.totalorder %s630_s9, %s626_s6  ;;  %p634_p12 = scmp.lt.u32.totalorder %s626_s6, %s778_s28 }
 0x102   : > { %p628_p7 = pnand %p627_p4, %p737_p5 }
 0x103   : > { %p633_p11 = por %p632_p10, %p631_p9 }
 0x104   : > { %p629_p8 = pneg %p628_p7 }
 0x105   : > { %p635_p13 = por %p634_p12, %p633_p11 }
 0x107   : > { %p636_p0 = pnand %p635_p13, %p629_p8 }
 0x109   : > { %639 = shalt.err (!%p636_p0)
}
 0x10a   : > { %s677_s17 = smov 128   ;;  %s678_s20 = smov 8  }
 0x10b   : > { %571 = dma.vmem_to_hbm [thread:$0]  (%p737_p5), %s780_s19, 256, %s778_s28, %s782_s16, %s677_s17, %s677_s17, %s678_s20  }
 0x10c PF: > { %p577_p1 = scmp.ge.s32.totalorder %s674_s15, 2  ;;  %s472_s24 = sand.u32 1, %s662_s12  }
 0x10d   : > { %s473_s25 = scalar_lea.sflag [#allocation3], %s472_s24 }
 0x10e   : > { %p574_p2 = pnand %p577_p1, %p741_p6 }
 0x110   : > { %657 = dma.done.wait (!%p574_p2), %s473_s25, 256  }
 0x111   : > { %659 = vsyncadd (!%p574_p2), %s473_s25, 4294967040  ;;  %p13_p3 = scmp.ge.s32.totalorder %s724_s18, 4   ;;  %s829_s12 = smov %s666_s13 }
 0x112   : > { %s830_s13 = smov %s670_s14  ;;  %s831_s14 = smov %s735_s21 }
 0x113   : > { %s832_s15 = smov %s724_s18  ;;  %15 = sbr.rel (!%p13_p3) target bundleno = 3 (0x3), region = 69 }
 0x11a   :  { %478 = vsyncpa [#allocation3], 1 }
 0x11b   :  { %480 = vsyncpa [#allocation3 + $0x1], 1 }

</bundles_post_ra>
